<compile_context>
chip_gen: v6e
topology: v6e:2x2x1
jax: 0.10.0
libtpu: 0.0.40
codegen_flags: <defaults>
</compile_context>

<pallas_src>
import math

import jax
import jax.numpy as jnp
from jax.experimental import pallas as pl
from jax.experimental.pallas import tpu as pltpu


# --------------------------------- fused GCN kernel ---------------------------------
def _gcn_kernel(x_ref, adj_ref, w_ref, o_ref, support_ref):
    # x_ref      : (gb, N, Fin)    bf16, revisited (constant index) across row tiles
    # adj_ref    : (gb, tn, N)     bf16
    # w_ref      : (Fin, Fout)     bf16, constant index_map -> loaded once
    # o_ref      : (gb, tn, Fout)  f32
    # support_ref: (gb, N, Fout)   bf16 VMEM scratch, persists across row tiles
    gb, N, Fin = x_ref.shape
    Fout = w_ref.shape[1]

    # Stage 1 (once per graph block): support = x @ W as ONE sublane-dense 2-D MXU
    # matmul over all graphs in the block (M = gb*N rows), f32 accumulation.
    @pl.when(pl.program_id(1) == 0)
    def _():
        x2d = x_ref[...].reshape(gb * N, Fin)
        s = jnp.dot(x2d, w_ref[...], preferred_element_type=jnp.float32)
        support_ref[...] = s.reshape(gb, N, Fout).astype(support_ref.dtype)

    # Stage 2: out[g, rows, :] = adj[g, rows, :] @ support[g]  (batched over graphs).
    out = jnp.einsum('gij,gjf->gif', adj_ref[...], support_ref[...],
                     preferred_element_type=jnp.float32)
    o_ref[...] = out.astype(o_ref.dtype)


# --------------------------------- tiling heuristics ---------------------------------
def _vmem_capacity_bytes():
    try:
        return int(pltpu.get_tpu_info().vmem_capacity_bytes)
    except Exception:
        return 64 << 20  # conservative: v7x has 64 MiB per TensorCore


def _block_bytes(gb, tn, N, Fin, Fout, in_bytes, out_bytes):
    # Double-buffered pipelined blocks + support scratch + (double-buffered) weight.
    pipelined = 2 * gb * (N * Fin * in_bytes + tn * N * in_bytes + tn * Fout * out_bytes)
    scratch = gb * N * Fout * in_bytes
    weight = 2 * Fin * Fout * in_bytes
    return pipelined + scratch + weight


def graph_convolution(x, adj, weight, *, compute_dtype=jnp.bfloat16,
                      graphs_per_block=None, row_tile=None):
    """Fused GraphConvolution forward.

    x      : (B, W, N, Fin)
    adj    : (B, W, N, N)
    weight : (Fin, Fout)
    returns: (B, W, N, Fout) in x.dtype
    """
    B, W, N, Fin = x.shape
    Fout = weight.shape[1]
    G = B * W
    out_dtype = x.dtype
    ib = jnp.dtype(compute_dtype).itemsize
    ob = jnp.dtype(out_dtype).itemsize

    vmem_cap = _vmem_capacity_bytes()
    budget = int(0.6 * vmem_cap)  # headroom for compiler scratch / semaphores

    # ---- row tile (tn) over the N output rows of adj ---------------------------
    if row_tile is not None:
        tn = row_tile
    elif _block_bytes(1, N, N, Fin, Fout, ib, ob) <= budget:
        tn = N  # whole graphs fit: no row tiling needed
    else:
        cands = [t for t in range(8, N, 8)
                 if _block_bytes(1, t, N, Fin, Fout, ib, ob) <= budget]
        tn = cands[-1] if cands else min(N, 8)

    # ---- graphs per block (gb) --------------------------------------------------
    if graphs_per_block is not None:
        gb = graphs_per_block
    else:
        gb_max = 1
        for g in range(1, G + 1):
            if _block_bytes(g, tn, N, Fin, Fout, ib, ob) <= budget:
                gb_max = g
            else:
                break
        # Candidates: divisors of G (no padding waste) plus everything within 2x
        # of the largest block that fits (so awkward/prime G doesn't force gb=1).
        cand = sorted(set([d for d in range(1, gb_max + 1) if G % d == 0]
                          + list(range(max(1, (gb_max + 1) // 2), gb_max + 1))))

        def score(c):
            steps = pl.cdiv(G, c)
            waste = steps * c - G              # padded (zero) graphs
            big_enough = c * 2 >= gb_max       # block within 2x of the largest fit
            even = steps % 2 == 0              # v7x 2-TC balance + DMA/compute overlap
            return (big_enough, even, -waste, c)

        gb = max(cand, key=score)

    grid_g = pl.cdiv(G, gb)
    grid_r = pl.cdiv(N, tn)
    G_pad = grid_g * gb

    # ---- prepare inputs (bf16 compute dtype; f32 accumulation in-kernel) --------
    xg = x.reshape(G, N, Fin).astype(compute_dtype)
    ag = adj.reshape(G, N, N).astype(compute_dtype)
    wg = weight.astype(compute_dtype)
    if G_pad != G:
        xg = jnp.pad(xg, ((0, G_pad - G), (0, 0), (0, 0)))
        ag = jnp.pad(ag, ((0, G_pad - G), (0, 0), (0, 0)))

    needed = _block_bytes(gb, tn, N, Fin, Fout, ib, ob)
    vmem_limit = int(min(vmem_cap, max(needed + (4 << 20), 32 << 20)))

    cost = pl.CostEstimate(
        flops=2 * G_pad * N * Fout * (Fin + N),
        transcendentals=0,
        bytes_accessed=(G_pad * (N * Fin + N * N) * ib
                        + Fin * Fout * ib
                        + G_pad * N * Fout * ob),
    )

    out = pl.pallas_call(
        _gcn_kernel,
        out_shape=jax.ShapeDtypeStruct((G_pad, N, Fout), out_dtype),
        grid=(grid_g, grid_r),
        in_specs=[
            pl.BlockSpec((gb, N, Fin), lambda g, r: (g, 0, 0)),
            pl.BlockSpec((gb, tn, N), lambda g, r: (g, r, 0)),
            # Constant block index across the whole grid -> weight DMA'd once.
            # TODO(synk): pipeline_mode=pl.Buffered(1) would drop the 2nd weight
            # buffer for huge Fin*Fout; left at default for compile robustness.
            pl.BlockSpec((Fin, Fout), lambda g, r: (0, 0)),
        ],
        out_specs=pl.BlockSpec((gb, tn, Fout), lambda g, r: (g, r, 0)),
        scratch_shapes=[pltpu.VMEM((gb, N, Fout), compute_dtype)],
        compiler_params=pltpu.CompilerParams(
            dimension_semantics=("parallel", "arbitrary"),
            vmem_limit_bytes=vmem_limit,
        ),
        cost_estimate=cost,
    )(xg, ag, wg)

    if G_pad != G:
        out = out[:G]
    return out.reshape(B, W, N, Fout)


# ------------------------------- reference & params ---------------------------------
def graph_convolution_ref(x, adj, weight):
    support = jnp.einsum('bwnf,fh->bwnh', x, weight)
    return jnp.einsum('bwnm,bwmh->bwnh', adj, support)


def init_graph_convolution_params(key, input_dim, output_dim):
    # torch.nn.init.xavier_uniform_(weight, gain=sqrt(2)):
    #   U(-a, a) with a = gain * sqrt(6 / (fan_in + fan_out))
    a = math.sqrt(2.0) * math.sqrt(6.0 / (input_dim + output_dim))
    weight = jax.random.uniform(key, (input_dim, output_dim), jnp.float32, -a, a)
    bias = jnp.zeros((output_dim,), jnp.float32)
    # TODO(synk): self.bias is declared (uninitialized) in the reference module but
    # never used in its forward(); kept only for parameter parity.
    return {'weight': weight, 'bias': bias}


# -------------------------------------- main -----------------------------------------
if __name__ == "__main__":
    # Small shapes consistent with the module layout (B, num_windows, num_nodes, nfeat).
    B, W, N, FIN, FOUT = 2, 4, 16, 16, 32

    key = jax.random.PRNGKey(0)
    kx, kadj, kw = jax.random.split(key, 3)
    x = jax.random.normal(kx, (B, W, N, FIN), dtype=jnp.float32)
    adj = jax.random.normal(kadj, (B, W, N, N), dtype=jnp.float32)
    params = init_graph_convolution_params(kw, FIN, FOUT)

    fwd = jax.jit(graph_convolution)
    out = fwd(x, adj, params['weight'])
    jax.block_until_ready(out)

    ref = graph_convolution_ref(x, adj, params['weight'])
    assert out.shape == (B, W, N, FOUT)
    assert bool(jnp.isfinite(out).all())
    # bf16 MXU inputs with f32 accumulation: compare on a scale-relative max error.
    rel_err = float(jnp.max(jnp.abs(out - ref)) / jnp.max(jnp.abs(ref)))
    assert rel_err < 2.5e-2, rel_err
    print("KERNEL_OK")
</pallas_src>

<mosaic_0001>
module attributes {stable_mosaic.version = 11 : i64} {
  func.func @_gcn_kernel(%arg0: i32, %arg1: i32, %arg2: memref<4x16x16xbf16, #tpu.memory_space<vmem>>, %arg3: memref<4x16x16xbf16, #tpu.memory_space<vmem>>, %arg4: memref<16x32xbf16, #tpu.memory_space<vmem>>, %arg5: memref<4x16x32xf32, #tpu.memory_space<vmem>>, %arg6: memref<4x16x32xbf16, #tpu.memory_space<vmem>>) attributes {dimension_semantics = [#tpu.dimension_semantics<parallel>, #tpu.dimension_semantics<arbitrary>], iteration_bounds = array<i64: 2, 1>, scalar_prefetch = 0 : i64, scratch_operands = 1 : i64, tpu.core_type = #tpu.core_type<tc>, window_params = [{transform_indices = @transform_0, window_bounds = array<i64: 4, 16, 16>}, {transform_indices = @transform_1, window_bounds = array<i64: 4, 16, 16>}, {pipeline_mode = #tpu.pipeline_mode<synchronous>, transform_indices = @transform_2, window_bounds = array<i64: 16, 32>}, {transform_indices = @transform_3, window_bounds = array<i64: 4, 16, 32>}]} {
    %c0_i32 = arith.constant 0 : i32
    %0 = arith.cmpi eq, %arg1, %c0_i32 : i32
    %1 = arith.extui %0 : i1 to i32
    %c0_i32_0 = arith.constant 0 : i32
    %2 = arith.cmpi ne, %1, %c0_i32_0 : i32
    scf.if %2 {
      %c0_9 = arith.constant 0 : index
      %c0_10 = arith.constant 0 : index
      %c0_11 = arith.constant 0 : index
      %7 = vector.load %arg2[%c0_9, %c0_10, %c0_11] : memref<4x16x16xbf16, #tpu.memory_space<vmem>>, vector<4x16x16xbf16>
      %8 = vector.shape_cast %7 : vector<4x16x16xbf16> to vector<64x16xbf16>
      %c0_12 = arith.constant 0 : index
      %c0_13 = arith.constant 0 : index
      %9 = vector.load %arg4[%c0_12, %c0_13] : memref<16x32xbf16, #tpu.memory_space<vmem>>, vector<16x32xbf16>
      %cst_14 = arith.constant dense<0.000000e+00> : vector<64x32xf32>
      %10 = tpu.matmul %8, %9, %cst_14 {dimension_numbers = #tpu.dot_dimension_numbers<[1], [0], [0], [1], [0, 0, 1, 1], [], []>} : vector<64x16xbf16>, vector<16x32xbf16>, vector<64x32xf32> -> vector<64x32xf32>
      %11 = vector.shape_cast %10 : vector<64x32xf32> to vector<4x16x32xf32>
      %12 = arith.truncf %11 : vector<4x16x32xf32> to vector<4x16x32xbf16>
      %c0_15 = arith.constant 0 : index
      %c0_16 = arith.constant 0 : index
      %c0_17 = arith.constant 0 : index
      %13 = vector.load %arg6[%c0_15, %c0_16, %c0_17] : memref<4x16x32xbf16, #tpu.memory_space<vmem>>, vector<4x16x32xbf16>
      tpu.vector_store %arg6[%c0_15, %c0_16, %c0_17], %12 {strides = array<i32>} : memref<4x16x32xbf16, #tpu.memory_space<vmem>>, vector<4x16x32xbf16>,
    } else {
    }
    %c0 = arith.constant 0 : index
    %c0_1 = arith.constant 0 : index
    %c0_2 = arith.constant 0 : index
    %3 = vector.load %arg3[%c0, %c0_1, %c0_2] : memref<4x16x16xbf16, #tpu.memory_space<vmem>>, vector<4x16x16xbf16>
    %c0_3 = arith.constant 0 : index
    %c0_4 = arith.constant 0 : index
    %c0_5 = arith.constant 0 : index
    %4 = vector.load %arg6[%c0_3, %c0_4, %c0_5] : memref<4x16x32xbf16, #tpu.memory_space<vmem>>, vector<4x16x32xbf16>
    "tpu.trace_start"() <{level = 10 : i32, message = "gij,gjf->gif"}> : () -> ()
    %cst = arith.constant dense<0.000000e+00> : vector<4x16x32xf32>
    %5 = tpu.matmul %3, %4, %cst {dimension_numbers = #tpu.dot_dimension_numbers<[2], [1], [1], [2], [0, 0, 0, 1, 1, 2], [0], [0]>} : vector<4x16x16xbf16>, vector<4x16x32xbf16>, vector<4x16x32xf32> -> vector<4x16x32xf32>
    "tpu.trace_stop"() : () -> ()
    %c0_6 = arith.constant 0 : index
    %c0_7 = arith.constant 0 : index
    %c0_8 = arith.constant 0 : index
    %6 = vector.load %arg5[%c0_6, %c0_7, %c0_8] : memref<4x16x32xf32, #tpu.memory_space<vmem>>, vector<4x16x32xf32>
    tpu.vector_store %arg5[%c0_6, %c0_7, %c0_8], %5 {strides = array<i32>} : memref<4x16x32xf32, #tpu.memory_space<vmem>>, vector<4x16x32xf32>,
    return
  }
  func.func @transform_0(%arg0: i32, %arg1: i32) -> (i32, i32, i32) {
    %c0_i32 = arith.constant 0 : i32
    %c0_i32_0 = arith.constant 0 : i32
    %c0_i32_1 = arith.constant 0 : i32
    return %arg0, %c0_i32, %c0_i32_0 : i32, i32, i32
  }
  func.func @transform_1(%arg0: i32, %arg1: i32) -> (i32, i32, i32) {
    %c0_i32 = arith.constant 0 : i32
    %c0_i32_0 = arith.constant 0 : i32
    return %arg0, %arg1, %c0_i32 : i32, i32, i32
  }
  func.func @transform_2(%arg0: i32, %arg1: i32) -> (i32, i32) {
    %c0_i32 = arith.constant 0 : i32
    %c0_i32_0 = arith.constant 0 : i32
    %c0_i32_1 = arith.constant 0 : i32
    return %c0_i32, %c0_i32_0 : i32, i32
  }
  func.func @transform_3(%arg0: i32, %arg1: i32) -> (i32, i32, i32) {
    %c0_i32 = arith.constant 0 : i32
    %c0_i32_0 = arith.constant 0 : i32
    return %arg0, %arg1, %c0_i32 : i32, i32, i32
  }
}

</mosaic_0001>

<bundles_post_ra>
// kernel: graph_convolution.1
= control target key start
LH: loop header
LB: loop body
LE: loop exit
PB: predicated region body
PF: predicated region fallthrough
CT: control target
= control target key end

     0   :  { %8 = vsyncpa [#allocation4], 0  ;;  %s1183_s0 = inlined_call_operand.vmem [shape: bf16[8,16,16], index: 0, kind: input, shape index: {}]   ;;  %s1184_s1 = inlined_call_operand.vmem [shape: bf16[8,16,16], index: 1, kind: input, shape index: {}]   ;;  %s1185_s2 = inlined_call_operand.vmem [shape: bf16[16,32], index: 2, kind: input, shape index: {}]   ;;  %s1186_s3 = inlined_call_operand.hbm [shape: f32[8,16,32], index: 3, kind: output, shape index: {}]  }
   0x1   :  { %10 = vsyncpa [#allocation4 + $0x1], 0  ;;  %s1026_s12 = smov 0   ;;  %s1028_s13 = smov 0  }
   0x2   :  { %s1030_s14 = smov 0   ;;  %s1032_s15 = smov 0  }
   0x3   :  { %s1034_s16 = smov 0   ;;  %s1036_s17 = smov 0  }
   0x4 LB: > { %s745_s18 = sadd.s32 4294967295, %s999_s17   ;;  %s746_s19 = sadd.s32 4294967294, %s999_s17   ;;  %s999_s17 = sphi %s1036_s17, %s16_s17   ;;  %s995_s16 = sphi %s1034_s16, %s1193_s16   ;;  %s991_s15 = sphi %s1032_s15, %s1192_s15   ;;  %s987_s14 = sphi %s1030_s14, %s1191_s14   ;;  %s983_s13 = sphi %s1028_s13, %s1190_s13   ;;  %s979_s12 = sphi %s1026_s12, %s1189_s12  }
   0x5   : > { %s28_s20 = sadd.s32 1, %s995_s16  ;;  %s112_s21 = sadd.s32 1, %s987_s14 }
   0x6   : > { %p30_p0 = scmp.ge.s32.totalorder %s28_s20, 2  ;;  %p122_p1 = scmp.ne.s32.totalorder %s987_s14, %s983_s13 }
   0x7   : > { %p123_p2 = scmp.eq.s32.totalorder %s745_s18, 1  ;;  %p128_p3 = scmp.ne.s32.totalorder %s983_s13, %s979_s12 }
   0x8   : > { %s1195_s20 = smov (%p30_p0, %s28_s20), 0  ;;  %p129_p5 = scmp.eq.s32.totalorder %s746_s19, 1 }
   0x9   : > { %p1066_p4 = por %p123_p2, %p122_p1  ;;  %s107_s23 = ssub.s32 %s995_s16, %s1195_s20 }
   0xa   : > { %p749_p6 = scmp.ge.s32.totalorder %s999_s17, 1  ;;  %p110_p7 = scmp.eq.s32.totalorder %s107_s23, 0 }
   0xb   : > { %p1073_p8 = por %p129_p5, %p128_p3  ;;  %p175_p9 = scmp.lt.s32.totalorder %s999_s17, 3 }
   0xc   : > { %s1079_s25 = scalar_select %p110_p7, %s987_s14, %s112_s21  }
   0xd   : > { %p176_p10 = pnand %p749_p6, %p175_p9 }
   0xe   : > { %s751_s28 = sshll.u32 (!%p176_p10), %s991_s15, 2  ;;  %s207_s9 = sand.u32 (!%p176_p10), 1, %s983_s13  }
   0xf   : > { %179 = sbr.rel (%p176_p10) target bundleno = 465 (0x1d1), region = 32  ;;  %p211_p11 = scmp.lt.s32.totalorder (!%p176_p10), %s751_s28, 7 }
  0x10   : > { %s750_s10 = sshll.u32 (!%p176_p10), %s207_s9, 6  ;;  %s803_s18 = sshll.u32 (!%p176_p10), %s991_s15, 10 }
  0x11   : > { %s209_s11 = scalar_lea.vmem (!%p176_p10), [#allocation3], %s750_s10  ;;  %s1131_s26 = scalar_lea.hbm (!%p176_p10), %s1186_s3, %s803_s18 }
  0x12   : > { %s654_s19 = sshll.u32 (!%p176_p10), %s209_s11, 4  ;;  %s1138_s15 = scalar_lea.sflag (!%p176_p10), [#allocation4], %s207_s9  ;;  %s1133_s19 = int_to_ptr.vmem [resolvable:$true] %s654_s19 }
  0x13   : > { %s923_s27 = scalar_lea.vmem (!%p176_p10), %s1133_s19, 1024 }
  0x14   : > { %v910_v0 = vld [vmem:[%s1185_s2] sm:$0xff]   ;;  %s1197_s28 = smov (!%p211_p11, %s751_s28), 7  ;;  %vm272_vm0 = vcmask 130048   ;;  %v1001_v5 = vmov 0.0   ;;  %vm1002_vm1 = vmmov 0   ;;  %vm382_vm2 = vcmask 257024   ;;  %p924_p12 = scmp.ne.s32.totalorder %s1133_s19, %s923_s27 }
  0x15   : > { %817 = vmatprep.subr.bf16.mxu0 %v910_v0  ;;  %s792_s29 = sshll.u32 %s1197_s28, 3  ;;  %827 = vmatprep.subr.bf16.mxu1 %v1001_v5  ;;  %vm628_vm3 = vcmask 261120   ;;  %s1003_s28 = smov [#allocation3]  }
  0x16   : > { %818 = vmatpush3.bf16.msra.mxu0 %v910_v0  ;;  %s215_s5 = scalar_lea.vmem %s1183_s0, %s792_s29  ;;  %s1092_s8 = scalar_lea.vmem %s1184_s1, %s792_s29  ;;  %829 = vmatprep.mubr.msk.bf16.mxu1 %vm1002_vm1, %v1001_v5 }
  0x17   : > { %v911_v1 = vld [vmem:[%s215_s5] sm:$0xff]   ;;  %v912_v2 = vld [vmem:[%s215_s5 + $0x8] sm:$0xff]   ;;  %v913_v3 = vld [vmem:[%s215_s5 + $0x10] sm:$0xff]   ;;  %839 = vmatprep.subr.bf16.mxu0 %v1001_v5  ;;  %p925_p13 = pnand %p924_p12, %p1066_p4  ;;  %s927_s29 = sshll.u32 %s1003_s28, 4  ;;  %s928_s29 = int_to_ptr.vmem [resolvable:$false] %s927_s29 }
  0x18   : > { %819 = vmatprep.mubr.msk.bf16.mxu0 %vm272_vm0, %v911_v1  ;;  %v914_v4 = vld [vmem:[%s215_s5 + $0x18] sm:$0xff]   ;;  %v916_v23 = vld [vmem:[%s1092_s8] sm:$0xff]   ;;  %v919_v26 = vld [vmem:[%s1092_s8 + $0x8] sm:$0xff]   ;;  %s929_s30 = scalar_lea.vmem %s928_s29, 2048  ;;  %p930_p1 = scmp.lt.s32.totalorder %s1133_s19, %s928_s29 }
  0x19   : > { %820 = vmatmul.mubr.msk.bf16.vlgmr.msra.gmra.mxu0 %vm272_vm0, %v912_v2  ;;  %v921_v27 = vld [vmem:[%s1092_s8 + $0x10] sm:$0xff]   ;;  %v922_v29 = vld [vmem:[%s1092_s8 + $0x18] sm:$0xff]   ;;  %p926_p0 = pneg %p925_p13  ;;  %p931_p2 = scmp.lt.s32.totalorder %s929_s30, %s923_s27 }
  0x1a   : > { %823 = vmatprep.mubr.msk.bf16.mxu0 %vm272_vm0, %v913_v3 }
  0x1b   : > { %p932_p3 = por %p931_p2, %p930_p1 }
  0x1d   : > { %p933_p5 = pnand %p932_p3, %p926_p0 }
  0x21   : > { %824 = vmatmul.mubr.msk.bf16.gmra.mxu0 %vm272_vm0, %v914_v4 }
  0x22   : > { %841 = vmatprep.mubr.msk.bf16.mxu0 %vm1002_vm1, %v1001_v5 }
  0xd9   : > { %v821_v6 = vpop.f32.mrf.mxu0 }
  0xda   : > { %v796_v7 = vpack.c.bf16 %v821_v6, %v821_v6 }
  0xdb   : > { %v319_v8 = vpop.f32.mrf.mxu0 }
  0xdc   : > { %385 = vst.msk [vmem:[#allocation2 + $0x8] sm:$0xf] %vm382_vm2, %v796_v7  ;;  %v794_v9 = vpack.c.bf16 %v319_v8, %v319_v8 }
  0xdd   : > { %v822_v10 = vpop.f32.mrf.mxu0 }
  0xde   : > { %383 = vst.msk [vmem:[#allocation2] sm:$0xf] %vm382_vm2, %v794_v9  ;;  %v797_v11 = vpack.c.bf16 %v822_v10, %v822_v10 }
  0xdf   : > { %v322_v12 = vpop.f32.mrf.mxu0 }
  0xe0   : > { %386 = vst.msk [vmem:[#allocation2 + $0xc] sm:$0xf] %vm382_vm2, %v797_v11  ;;  %v795_v13 = vpack.c.bf16 %v322_v12, %v322_v12 }
  0xe1   : > { %v825_v14 = vpop.f32.mrf.mxu0 }
  0xe2   : > { %384 = vst.msk [vmem:[#allocation2 + $0x4] sm:$0xf] %vm382_vm2, %v795_v13  ;;  %v800_v15 = vpack.c.bf16 %v825_v14, %v825_v14 }
  0xe3   : > { %v335_v16 = vpop.f32.mrf.mxu0 }
  0xe4   : > { %389 = vst.msk [vmem:[#allocation2 + $0x18] sm:$0xf] %vm382_vm2, %v800_v15  ;;  %v798_v17 = vpack.c.bf16 %v335_v16, %v335_v16 }
  0xe5   : > { %v826_v18 = vpop.f32.mrf.mxu0 }
  0xe6   : > { %387 = vst.msk [vmem:[#allocation2 + $0x10] sm:$0xf] %vm382_vm2, %v798_v17  ;;  %v801_v19 = vpack.c.bf16 %v826_v18, %v826_v18 }
  0xe7   : > { %v338_v20 = vpop.f32.mrf.mxu0  ;;  %v917_v24 = vld [vmem:[#allocation2 + $0x8] sm:$0xff]  }
  0xe8   : > { %390 = vst.msk [vmem:[#allocation2 + $0x1c] sm:$0xf] %vm382_vm2, %v801_v19  ;;  %v799_v21 = vpack.c.bf16 %v338_v20, %v338_v20 }
  0xe9   : > { %v915_v22 = vld [vmem:[#allocation2] sm:$0xff]  }
  0xea   : > { %388 = vst.msk [vmem:[#allocation2 + $0x14] sm:$0xf] %vm382_vm2, %v799_v21  ;;  %828 = vmatpush3.bf16.msra.mxu1 %v915_v22 }
  0xeb   : > { %833 = vmatprep.subr.bf16.mxu1 %v1001_v5 }
  0xed   : > { %830 = vmatmul.mubr.msk.bf16.vlgmr.msra.gmra.mxu1 %vm272_vm0, %v916_v23 }
  0xee   : > { %834 = vmatpush3.bf16.msra.mxu1 %v917_v24  ;;  %835 = vmatprep.mubr.msk.bf16.mxu1 %vm1002_vm1, %v1001_v5 }
  0xef   : > { %845 = vmatprep.subr.bf16.mxu1 %v1001_v5  ;;  %v920_v28 = vld [vmem:[#allocation2 + $0x18] sm:$0xff]  }
  0xf1   : > { %v918_v25 = vld [vmem:[#allocation2 + $0x10] sm:$0xff]  }
  0xf2   : > { %840 = vmatpush3.bf16.msra.mxu0 %v918_v25 }
  0xf5   : > { %836 = vmatmul.mubr.msk.bf16.vlgmr.msra.gmra.mxu1 %vm272_vm0, %v919_v26  ;;  %842 = vmatmul.mubr.msk.bf16.vlgmr.msra.gmra.mxu0 %vm272_vm0, %v921_v27 }
  0xf6   : > { %846 = vmatpush3.bf16.msra.mxu1 %v920_v28  ;;  %847 = vmatprep.mubr.msk.bf16.mxu1 %vm1002_vm1, %v1001_v5 }
  0xfd   : > { %848 = vmatmul.mubr.msk.bf16.vlgmr.msra.gmra.mxu1 %vm272_vm0, %v922_v29 }
 0x1ad   : > { %v456_v30 = vpop.f32.mrf.mxu1 }
 0x1ae   : > { %629 = vst.msk [vmem:[%s209_s11] sm:$0xff] %vm628_vm3, %v456_v30 }
 0x1af   : > { %v831_v31 = vpop.f32.mrf.mxu1 }
 0x1b1   : > { %v459_v32 = vpop.f32.mrf.mxu1 }
 0x1b2   : > { %630 = vst.msk [vmem:[%s209_s11 + $0x8] sm:$0xff] %vm628_vm3, %v459_v32 }
 0x1b3   : > { %v832_v33 = vpop.f32.mrf.mxu1 }
 0x1b5   : > { %v511_v34 = vpop.f32.mrf.mxu1  ;;  %v566_v35 = vpop.f32.mrf.mxu0 }
 0x1b6   : > { %631 = vst.msk [vmem:[%s209_s11 + $0x10] sm:$0xff] %vm628_vm3, %v511_v34  ;;  %633 = vst.msk [vmem:[%s209_s11 + $0x20] sm:$0xff] %vm628_vm3, %v566_v35 }
 0x1b7   : > { %v837_v36 = vpop.f32.mrf.mxu1  ;;  %v843_v37 = vpop.f32.mrf.mxu0 }
 0x1b9   : > { %v514_v38 = vpop.f32.mrf.mxu1  ;;  %v569_v39 = vpop.f32.mrf.mxu0 }
 0x1ba   : > { %632 = vst.msk [vmem:[%s209_s11 + $0x18] sm:$0xff] %vm628_vm3, %v514_v38  ;;  %634 = vst.msk [vmem:[%s209_s11 + $0x28] sm:$0xff] %vm628_vm3, %v569_v39 }
 0x1bb   : > { %v838_v40 = vpop.f32.mrf.mxu1  ;;  %v844_v41 = vpop.f32.mrf.mxu0 }
 0x1bd   : > { %v621_v42 = vpop.f32.mrf.mxu1 }
 0x1be   : > { %635 = vst.msk [vmem:[%s209_s11 + $0x30] sm:$0xff] %vm628_vm3, %v621_v42 }
 0x1bf   : > { %v849_v43 = vpop.f32.mrf.mxu1 }
 0x1c1   : > { %v624_v44 = vpop.f32.mrf.mxu1 }
 0x1c2   : > { %636 = vst.msk [vmem:[%s209_s11 + $0x38] sm:$0xff] %vm628_vm3, %v624_v44 }
 0x1c3   : > { %v850_v45 = vpop.f32.mrf.mxu1 }
 0x1c4   : > { %936 = shalt.err (!%p933_p5)
}
 0x1c5   : > { %s937_s4 = scalar_lea.hbm %s1131_s26, 1024  ;;  %s941_s7 = scalar_lea.hbm %s1186_s3, 2048 }
 0x1c6   : > { %p938_p6 = scmp.ne.s32.totalorder %s1131_s26, %s937_s4  ;;  %p942_p10 = scmp.lt.s32.totalorder %s1131_s26, %s1186_s3 }
 0x1c7   : > { %p943_p11 = scmp.lt.s32.totalorder %s941_s7, %s937_s4 }
 0x1c8   : > { %p939_p7 = pnand %p938_p6, %p1066_p4 }
 0x1c9   : > { %p944_p12 = por %p943_p11, %p942_p10 }
 0x1ca   : > { %p940_p9 = pneg %p939_p7 }
 0x1cc   : > { %p945_p13 = pnand %p944_p12, %p940_p9 }
 0x1ce   : > { %948 = shalt.err (!%p945_p13)
}
 0x1cf   : > { %s1004_s10 = smov 128   ;;  %s1005_s11 = smov 8  }
 0x1d0   : > { %851 = dma.vmem_to_hbm [thread:$0]  (%p1066_p4), %s1133_s19, 1024, %s1131_s26, %s1138_s15, %s1004_s10, %s1004_s10, %s1005_s11  }
 0x1d1 PF: > { %p857_p0 = scmp.ge.s32.totalorder %s999_s17, 2  ;;  %s669_s18 = sand.u32 1, %s979_s12  }
 0x1d2   : > { %s670_s21 = scalar_lea.sflag [#allocation4], %s669_s18 }
 0x1d3   : > { %p854_p1 = pnand %p857_p0, %p1073_p8 }
 0x1d5   : > { %p855_p2 = pneg %p854_p1 }
 0x1d7   : > { %974 = dma.done.wait (%p855_p2), %s670_s21, 1024  }
 0x1d8   : > { %976 = vsyncadd (%p855_p2), %s670_s21, 4294966272  ;;  %s16_s17 = sadd.s32 1, %s999_s17   ;;  %s1189_s12 = smov %s983_s13 }
 0x1d9   : > { %p13_p3 = scmp.ge.s32.totalorder %s16_s17, 4   ;;  %s1190_s13 = smov %s987_s14 }
 0x1da   : > { %s1191_s14 = smov %s1079_s25  ;;  %s1192_s15 = smov %s995_s16 }
 0x1db   : > { %s1193_s16 = smov %s1195_s20  ;;  %15 = sbr.rel (!%p13_p3) target bundleno = 4 (0x4), region = 74 }
 0x1e0   :  { %675 = vsyncpa [#allocation4], 1 }
 0x1e1   :  { %677 = vsyncpa [#allocation4 + $0x1], 1 }

</bundles_post_ra>
